<compile_context>
chip_gen: v7x
topology: tpu7x:2x2x1
jax: 0.10.0
libtpu: 0.0.40
codegen_flags: <defaults>
</compile_context>

<pallas_src>
import functools

import jax
import jax.numpy as jnp
from jax.experimental import pallas as pl
from jax.experimental.pallas import tpu as pltpu


# ----------------------------------------------------------------------------
# Kernels
# ----------------------------------------------------------------------------
def _rmsnorm_kernel(x_ref, gamma_ref, o_ref, *, scale, eps):
    """Regular path: one logical row per physical row (dim >= 128 or odd dim)."""
    x = x_ref[...].astype(jnp.float32)                       # (TILE_R, dim)
    sumsq = jnp.sum(x * x, axis=-1, keepdims=True)           # XLU reduce
    inv = scale * jax.lax.rsqrt(jnp.maximum(sumsq, eps * eps))  # single EUP op
    o_ref[...] = (x * inv * gamma_ref[...]).astype(o_ref.dtype)


def _rmsnorm_kernel_packed(x_ref, gamma_ref, seg_ref, o_ref, *, scale, eps):
    """Packed path: g = 128//dim logical rows per 128-lane physical row.

    seg_ref is a (128,128) block-diagonal 0/1 matrix; (x*x) @ seg gives the
    per-segment sum of squares broadcast back over each segment's lanes.
    """
    x = x_ref[...].astype(jnp.float32)                        # (TILE_R, 128)
    sumsq = jnp.dot(x * x, seg_ref[...],
                    preferred_element_type=jnp.float32)       # MXU (free here)
    inv = scale * jax.lax.rsqrt(jnp.maximum(sumsq, eps * eps))
    o_ref[...] = (x * inv * gamma_ref[...]).astype(o_ref.dtype)


# ----------------------------------------------------------------------------
# Wrapper
# ----------------------------------------------------------------------------
def _pick_tile_target_bytes():
    """Effective per-tile byte budget (input tile + its f32 compute copy)."""
    try:
        vmem_cap = int(getattr(pltpu.get_tpu_info(), "vmem_capacity_bytes",
                               128 * 1024 * 1024))
    except Exception:
        vmem_cap = 128 * 1024 * 1024
    if vmem_cap <= 96 * 1024 * 1024:
        # v7x-class (64 MiB VMEM / TC, 3.2 TB/s HBM): bigger tiles to amortize
        # the ~0.35 us per-grid-step overhead.
        return 12 * 1024 * 1024
    # v5e / v6e (128 MiB VMEM): ~4 MiB f32 input per tile, well inside the
    # explicitly raised scoped limit below.
    return 8 * 1024 * 1024


def rmsnorm_forward(x, gamma, eps: float = 1e-12):
    """Matches RMSNorm.forward: F.normalize(x, dim=-1) * sqrt(dim) * gamma."""
    dim = x.shape[-1]
    scale = float(dim) ** 0.5
    orig_shape = x.shape
    orig_dtype = x.dtype
    itemsize = jnp.dtype(x.dtype).itemsize

    x2 = x.reshape(-1, dim)
    R = x2.shape[0]

    # ---- lane-dense packing for small dims --------------------------------
    packed = (dim < 128) and (128 % dim == 0)
    if packed:
        g = 128 // dim
        pad = (-R) % g
        if pad:
            x2 = jnp.concatenate([x2, jnp.zeros((pad, dim), x2.dtype)], axis=0)
        P = (R + pad) // g
        width = 128
        x2 = x2.reshape(P, width)
        gamma_row = jnp.tile(gamma.reshape(-1).astype(jnp.float32), g)
        gamma_row = gamma_row.reshape(1, width)
        seg_ids = jnp.arange(width) // dim
        seg_mat = (seg_ids[:, None] == seg_ids[None, :]).astype(jnp.float32)
    else:
        g = 1
        P = R
        width = dim
        gamma_row = gamma.reshape(1, dim).astype(jnp.float32)
        seg_mat = None

    # ---- row-tile sizing ---------------------------------------------------
    # Per element: `itemsize` bytes of I/O tile + 4 bytes for the in-kernel
    # f32 temporary (matters for bf16 inputs and enlarged tiles).
    target_bytes = _pick_tile_target_bytes()
    per_row_bytes = width * (itemsize + 4)
    if P <= 8:
        tile_r = P                          # full extent is always a legal tile
    else:
        tile_r = min(P, max(8, target_bytes // max(1, per_row_bytes)))
        tile_r = max(8, (tile_r // 8) * 8)
    grid = (pl.cdiv(P, tile_r),)

    compiler_params = pltpu.CompilerParams(
        dimension_semantics=("parallel",),
        vmem_limit_bytes=48 * 1024 * 1024,   # enlarged tiles fit on v5e/v6e/v7x
    )
    cost = pl.CostEstimate(
        flops=(4 + (2 * width if packed else 0)) * P * width,
        transcendentals=P * g,
        bytes_accessed=2 * P * width * itemsize + width * 4,
    )

    if packed:
        out = pl.pallas_call(
            functools.partial(_rmsnorm_kernel_packed, scale=scale, eps=eps),
            out_shape=jax.ShapeDtypeStruct((P, width), orig_dtype),
            grid=grid,
            in_specs=[
                pl.BlockSpec((tile_r, width), lambda i: (i, 0)),
                pl.BlockSpec((1, width), lambda i: (0, 0)),
                pl.BlockSpec((width, width), lambda i: (0, 0)),
            ],
            out_specs=pl.BlockSpec((tile_r, width), lambda i: (i, 0)),
            compiler_params=compiler_params,
            cost_estimate=cost,
        )(x2, gamma_row, seg_mat)
        out = out.reshape(-1, dim)[:R]
    else:
        out = pl.pallas_call(
            functools.partial(_rmsnorm_kernel, scale=scale, eps=eps),
            out_shape=jax.ShapeDtypeStruct((P, width), orig_dtype),
            grid=grid,
            in_specs=[
                pl.BlockSpec((tile_r, width), lambda i: (i, 0)),
                pl.BlockSpec((1, width), lambda i: (0, 0)),
            ],
            out_specs=pl.BlockSpec((tile_r, width), lambda i: (i, 0)),
            compiler_params=compiler_params,
            cost_estimate=cost,
        )(x2, gamma_row)

    return out.reshape(orig_shape)


# ----------------------------------------------------------------------------
# Reference + test
# ----------------------------------------------------------------------------
def _reference(x, gamma):
    # Pure-JAX reference matching F.normalize(x, dim=-1) * sqrt(dim) * gamma.
    dim = x.shape[-1]
    xf = x.astype(jnp.float32)
    norm = jnp.sqrt(jnp.sum(xf * xf, axis=-1, keepdims=True))
    denom = jnp.maximum(norm, 1e-12)
    return ((xf / denom) * (float(dim) ** 0.5) * gamma.astype(jnp.float32)
            ).astype(x.dtype)


if __name__ == "__main__":
    key = jax.random.PRNGKey(0)

    # Primary test: module-consistent small shapes, dim=32 exercises the
    # lane-dense packed path (g = 4 rows per 128-lane physical row).
    batch, seq, dim = 2, 8, 32
    x = jax.random.normal(key, (batch, seq, dim), dtype=jnp.float32)
    gamma = jnp.ones((dim,), dtype=jnp.float32)   # nn.Parameter(torch.ones(dim))

    y = jax.block_until_ready(rmsnorm_forward(x, gamma))
    ref = _reference(x, gamma)
    assert y.shape == (batch, seq, dim)
    assert y.dtype == jnp.float32
    assert jnp.allclose(y, ref, atol=1e-5, rtol=1e-5)

    # Secondary test: dim=256 exercises the regular (lane-aligned) path with a
    # non-trivial gamma.
    k1, k2 = jax.random.split(jax.random.PRNGKey(0))
    x2 = jax.random.normal(k1, (2, 8, 256), dtype=jnp.float32)
    g2 = 1.0 + 0.1 * jax.random.normal(k2, (256,), dtype=jnp.float32)
    y2 = jax.block_until_ready(rmsnorm_forward(x2, g2))
    assert jnp.allclose(y2, _reference(x2, g2), atol=1e-5, rtol=1e-5)

    print("KERNEL_OK")
</pallas_src>

<mosaic_0001>
module attributes {stable_mosaic.version = 11 : i64} {
  func.func @_rmsnorm_kernel_packed(%arg0: i32, %arg1: memref<4x128xf32, #tpu.memory_space<vmem>>, %arg2: memref<1x128xf32, #tpu.memory_space<vmem>>, %arg3: memref<128x128xf32, #tpu.memory_space<vmem>>, %arg4: memref<4x128xf32, #tpu.memory_space<vmem>>) attributes {dimension_semantics = [#tpu.dimension_semantics<parallel>], iteration_bounds = array<i64: 1>, scalar_prefetch = 0 : i64, scratch_operands = 0 : i64, tpu.core_type = #tpu.core_type<tc>, window_params = [{transform_indices = @transform_0, window_bounds = array<i64: 4, 128>}, {pipeline_mode = #tpu.pipeline_mode<synchronous>, transform_indices = @transform_1, window_bounds = array<i64: 1, 128>}, {pipeline_mode = #tpu.pipeline_mode<synchronous>, transform_indices = @transform_2, window_bounds = array<i64: 128, 128>}, {transform_indices = @transform_3, window_bounds = array<i64: 4, 128>}]} {
    %c0 = arith.constant 0 : index
    %c0_0 = arith.constant 0 : index
    %0 = vector.load %arg1[%c0, %c0_0] : memref<4x128xf32, #tpu.memory_space<vmem>>, vector<4x128xf32>
    %1 = arith.mulf %0, %0 : vector<4x128xf32>
    %c0_1 = arith.constant 0 : index
    %c0_2 = arith.constant 0 : index
    %2 = vector.load %arg3[%c0_1, %c0_2] : memref<128x128xf32, #tpu.memory_space<vmem>>, vector<128x128xf32>
    %cst = arith.constant dense<0.000000e+00> : vector<4x128xf32>
    %3 = tpu.matmul %1, %2, %cst {dimension_numbers = #tpu.dot_dimension_numbers<[1], [0], [0], [1], [0, 0, 1, 1], [], []>} : vector<4x128xf32>, vector<128x128xf32>, vector<4x128xf32> -> vector<4x128xf32>
    %cst_3 = arith.constant 1.000000e-24 : f32
    %4 = vector.broadcast %cst_3 : f32 to vector<4x128xf32>
    %5 = arith.maximumf %3, %4 : vector<4x128xf32>
    %6 = math.rsqrt %5 : vector<4x128xf32>
    %cst_4 = arith.constant 5.65685415 : f32
    %7 = vector.broadcast %cst_4 : f32 to vector<4x128xf32>
    %8 = arith.mulf %7, %6 : vector<4x128xf32>
    %9 = arith.mulf %0, %8 : vector<4x128xf32>
    %c0_5 = arith.constant 0 : index
    %c0_6 = arith.constant 0 : index
    %10 = vector.load %arg2[%c0_5, %c0_6] : memref<1x128xf32, #tpu.memory_space<vmem>>, vector<1x128xf32>
    %11 = vector.broadcast %10 : vector<1x128xf32> to vector<4x128xf32>
    %12 = arith.mulf %9, %11 : vector<4x128xf32>
    %c0_7 = arith.constant 0 : index
    %c0_8 = arith.constant 0 : index
    %13 = vector.load %arg4[%c0_7, %c0_8] : memref<4x128xf32, #tpu.memory_space<vmem>>, vector<4x128xf32>
    tpu.vector_store %arg4[%c0_7, %c0_8], %12 {strides = array<i32>} : memref<4x128xf32, #tpu.memory_space<vmem>>, vector<4x128xf32>,
    return
  }
  func.func @transform_0(%arg0: i32) -> (i32, i32) {
    %c0_i32 = arith.constant 0 : i32
    %c0_i32_0 = arith.constant 0 : i32
    return %arg0, %c0_i32 : i32, i32
  }
  func.func @transform_1(%arg0: i32) -> (i32, i32) {
    %c0_i32 = arith.constant 0 : i32
    %c0_i32_0 = arith.constant 0 : i32
    %c0_i32_1 = arith.constant 0 : i32
    return %c0_i32, %c0_i32_0 : i32, i32
  }
  func.func @transform_2(%arg0: i32) -> (i32, i32) {
    %c0_i32 = arith.constant 0 : i32
    %c0_i32_0 = arith.constant 0 : i32
    %c0_i32_1 = arith.constant 0 : i32
    return %c0_i32, %c0_i32_0 : i32, i32
  }
  func.func @transform_3(%arg0: i32) -> (i32, i32) {
    %c0_i32 = arith.constant 0 : i32
    %c0_i32_0 = arith.constant 0 : i32
    return %arg0, %c0_i32 : i32, i32
  }
}

</mosaic_0001>

<bundles_post_ra>
// kernel: tpu_custom_call.1
= control target key start
LH: loop header
LB: loop body
LE: loop exit
PB: predicated region body
PF: predicated region fallthrough
CT: control target
= control target key end

     0   :  { %8 = vsyncpa [#allocation3], 0  ;;  %s391_s0 = inlined_call_operand.hbm [shape: f32[4,128], index: 0, kind: input, shape index: {}]   ;;  %s392_s1 = inlined_call_operand.vmem [shape: f32[1,128], index: 1, kind: input, shape index: {}]   ;;  %s393_s2 = inlined_call_operand.hbm [shape: f32[128,128], index: 2, kind: input, shape index: {}]   ;;  %s394_s3 = inlined_call_operand.hbm [shape: f32[4,128], index: 3, kind: output, shape index: {}]  }
   0x1   :  { %9 = vsyncpa [#allocation6], 0 }
   0x2   :  { %10 = vsyncpa [#allocation4], 0  ;;  %s317_s12 = smov [#allocation2]   ;;  %s318_s14 = smov [#allocation5]  }
   0x3   :  { %s17_s13 = sshll.u32 %s317_s12, 4  ;;  %s28_s15 = sshll.u32 %s318_s14, 4  ;;  %s18_s13 = int_to_ptr.vmem [resolvable:$true] %s17_s13  ;;  %s345_s15 = int_to_ptr.vmem [resolvable:$true] %s28_s15 }
   0x4   :  { %s245_s18 = scalar_lea.hbm %s391_s0, 64 }
   0x5   :  { %p246_p0 = scmp.ne.s32.totalorder %s391_s0, %s245_s18  ;;  %p249_p1 = scmp.lt.u32.totalorder %s245_s18, %s391_s0 }
   0x7   :  { %p251_p2 = pnand %p249_p1, %p246_p0 }
   0x9   :  { %254 = shalt.err (!%p251_p2)
}
   0xa   :  { %s255_s23 = scalar_lea.vmem %s18_s13, 64  ;;  %p260_p4 = scmp.lt.s32.totalorder %s18_s13, %s18_s13 }
   0xb   :  { %p256_p3 = scmp.ne.s32.totalorder %s18_s13, %s255_s23  ;;  %p261_p5 = scmp.lt.s32.totalorder %s255_s23, %s255_s23 }
   0xd   :  { %p262_p6 = por %p261_p5, %p260_p4 }
   0xf   :  { %p263_p7 = pnand %p262_p6, %p256_p3 }
  0x11   :  { %266 = shalt.err (!%p263_p7)
}
  0x12   :  { %20 = dma.hbm_to_vmem [thread:$0]  %s391_s0, 64, %s18_s13, [#allocation3]  }
  0x13   :  { %s267_s28 = scalar_lea.hbm %s393_s2, 2048 }
  0x14   :  { %p268_p8 = scmp.ne.s32.totalorder %s393_s2, %s267_s28  ;;  %p271_p9 = scmp.lt.u32.totalorder %s267_s28, %s393_s2 }
  0x16   :  { %p273_p10 = pnand %p271_p9, %p268_p8 }
  0x18   :  { %276 = shalt.err (!%p273_p10)
}
  0x19   :  { %s277_s6 = scalar_lea.vmem %s345_s15, 2048  ;;  %p282_p12 = scmp.lt.s32.totalorder %s345_s15, %s345_s15 }
  0x1a   :  { %p278_p11 = scmp.ne.s32.totalorder %s345_s15, %s277_s6  ;;  %p283_p13 = scmp.lt.s32.totalorder %s277_s6, %s277_s6 }
  0x1c   :  { %p284_p0 = por %p283_p13, %p282_p12 }
  0x1e   :  { %p285_p1 = pnand %p284_p0, %p278_p11 }
  0x20   :  { %288 = shalt.err (!%p285_p1)
}
  0x21   :  { %s319_s0 = smov 128   ;;  %s320_s7 = smov 8  }
  0x22   :  { %34 = dma.hbm_to_vmem [thread:$0]  %s393_s2, 2048, %s345_s15, [#allocation6], %s319_s0, %s319_s0, %s320_s7  }
  0x23   :  { %311 = dma.done.wait [#allocation3], 64  }
  0x24   :  { %312 = vsyncadd [#allocation3], 4294967232 }
  0x25   :  { %313 = dma.done.wait [#allocation6], 2048  }
  0x26   :  { %314 = vsyncadd [#allocation6], 4294965248  ;;  %v321_v0 = vmov 0.0|0.0   ;;  %vm322_vm0 = vmmov 0   ;;  %v323_v1 = vmov 0.0   ;;  %v43_v2 = vld [vmem:[#allocation5] sm:$0xff] }
  0x27   :  { %211 = vmatprep.subr.bf16.mxu0 %v321_v0  ;;  %208 = vmatprep.mubr.msk.f32.mxu0 %vm322_vm0, %v323_v1  ;;  %v44_v3 = vld [vmem:[#allocation5 + $0x8] sm:$0xff]  ;;  %v45_v4 = vld [vmem:[#allocation5 + $0x10] sm:$0xff]  ;;  %v46_v6 = vld [vmem:[#allocation5 + $0x18] sm:$0xff]  ;;  %s324_s11 = smov [#allocation7]  }
  0x28   :  { %v212_v5 = vpack.c.bf16 %v44_v3, %v43_v2  ;;  %v215_v7 = vpack.c.bf16 %v46_v6, %v45_v4  ;;  %v47_v8 = vld [vmem:[#allocation5 + $0x20] sm:$0xff]  ;;  %v48_v9 = vld [vmem:[#allocation5 + $0x28] sm:$0xff]  ;;  %v49_v11 = vld [vmem:[#allocation5 + $0x30] sm:$0xff]  ;;  %s148_s12 = sshll.u32 %s324_s11, 4  ;;  %s149_s12 = int_to_ptr.vmem [resolvable:$true] %s148_s12 }
  0x29   :  { %v218_v10 = vpack.c.bf16 %v48_v9, %v47_v8  ;;  %v50_v12 = vld [vmem:[#allocation5 + $0x38] sm:$0xff]  ;;  %v51_v14 = vld [vmem:[#allocation5 + $0x40] sm:$0xff]  ;;  %v52_v15 = vld [vmem:[#allocation5 + $0x48] sm:$0xff]  ;;  %s289_s13 = scalar_lea.vmem %s149_s12, 64  ;;  %p294_p3 = scmp.lt.s32.totalorder %s149_s12, %s149_s12 }
  0x2a   :  { %213 = vmatpush3.bf16.msra.mxu0 %v212_v5  ;;  %v221_v13 = vpack.c.bf16 %v50_v12, %v49_v11  ;;  %v224_v16 = vpack.c.bf16 %v52_v15, %v51_v14  ;;  %v53_v17 = vld [vmem:[#allocation5 + $0x50] sm:$0xff]  ;;  %v54_v18 = vld [vmem:[#allocation5 + $0x58] sm:$0xff]  ;;  %v55_v20 = vld [vmem:[#allocation5 + $0x60] sm:$0xff]  ;;  %p290_p2 = scmp.ne.s32.totalorder %s149_s12, %s289_s13  ;;  %p295_p4 = scmp.lt.s32.totalorder %s289_s13, %s289_s13 }
  0x2b   :  { %214 = vmatprep.subr.bf16.mxu0 %v321_v0  ;;  %v227_v19 = vpack.c.bf16 %v54_v18, %v53_v17  ;;  %v56_v21 = vld [vmem:[#allocation5 + $0x68] sm:$0xff]  ;;  %v57_v23 = vld [vmem:[#allocation5 + $0x70] sm:$0xff]  ;;  %v58_v24 = vld [vmem:[#allocation5 + $0x78] sm:$0xff] }
  0x2c   :  { %v230_v22 = vpack.c.bf16 %v56_v21, %v55_v20  ;;  %v233_v25 = vpack.c.bf16 %v58_v24, %v57_v23  ;;  %v41_v26 = vld [vmem:[#allocation2] sm:$0xf]  ;;  %p296_p5 = por %p295_p4, %p294_p3 }
  0x2d   :  { %v42_v27 = vmul.f32 %v41_v26, %v41_v26  ;;  %v158_v33 = vld [vmem:[%s392_s1] ss:$0 sm:$0xff] }
  0x2e   :  { %216 = vmatpush3.bf16.msra.mxu0 %v215_v7  ;;  %p297_p6 = pnand %p296_p5, %p290_p2 }
  0x2f   :  { %217 = vmatprep.subr.bf16.mxu0 %v321_v0 }
  0x32   :  { %219 = vmatpush3.bf16.msra.mxu0 %v218_v10 }
  0x33   :  { %220 = vmatprep.subr.bf16.mxu0 %v321_v0 }
  0x36   :  { %222 = vmatpush3.bf16.msra.mxu0 %v221_v13 }
  0x37   :  { %223 = vmatprep.subr.bf16.mxu0 %v321_v0 }
  0x3a   :  { %225 = vmatpush3.bf16.msra.mxu0 %v224_v16 }
  0x3b   :  { %226 = vmatprep.subr.bf16.mxu0 %v321_v0 }
  0x3e   :  { %228 = vmatpush3.bf16.msra.mxu0 %v227_v19 }
  0x3f   :  { %229 = vmatprep.subr.bf16.mxu0 %v321_v0 }
  0x42   :  { %231 = vmatpush3.bf16.msra.mxu0 %v230_v22 }
  0x43   :  { %232 = vmatprep.subr.bf16.mxu0 %v321_v0 }
  0x46   :  { %234 = vmatpush3.bf16.msra.mxu0 %v233_v25 }
  0x49   :  { %209 = vmatmul.mubr.f32.vlgmr.msra.gmra.mrb[0].mxu0 %v42_v27 }
 0x11c   :  { %v125_v28 = vpop.f32.mrb[0].mxu0 }
 0x11d   :  { %v129_v29 = vmax.f32 %v125_v28, 1e-24  ;;  %v210_v30 = vpop.f32.mrb[1].mxu0 }
 0x11f   :  { %243 = vrsqrt.f32 %v129_v29 }
 0x129   :  { %v244_v31 = vpop.eup %243 }
 0x12a   :  { %v131_v32 = vmul.f32 5.656854, %v244_v31 }
 0x12c   :  { %v132_v34 = vmul.f32 %v131_v32, %v41_v26 }
 0x12e   :  { %v140_v35 = vmul.f32 %v158_v33, %v132_v34 }
 0x130   :  { %141 = vst [vmem:[#allocation7] sm:$0xf] %v140_v35 }
 0x131   :  { %300 = shalt.err (!%p297_p6)
}
 0x132   :  { %s301_s16 = scalar_lea.hbm %s394_s3, 64 }
 0x133   :  { %p302_p7 = scmp.ne.s32.totalorder %s394_s3, %s301_s16  ;;  %p305_p8 = scmp.lt.u32.totalorder %s301_s16, %s394_s3 }
 0x135   :  { %p307_p9 = pnand %p305_p8, %p302_p7 }
 0x137   :  { %310 = shalt.err (!%p307_p9)
}
 0x138   :  { %151 = dma.vmem_to_hbm [thread:$0]  %s149_s12, 64, %s394_s3, [#allocation4]  }
 0x139   :  { %315 = dma.done.wait [#allocation4], 64  }
 0x13a   :  { %316 = vsyncadd [#allocation4], 4294967232 }
 0x13b   :  { %155 = vsyncpa [#allocation3], 1 }
 0x13c   :  { %156 = vsyncpa [#allocation6], 1 }
 0x13d   :  { %157 = vsyncpa [#allocation4], 1 }

</bundles_post_ra>
